<compile_context>
chip_gen: v7x
topology: tpu7x:2x2x1
jax: 0.10.0
libtpu: 0.0.40
codegen_flags: <defaults>
</compile_context>

<pallas_src>
import functools

import jax
import jax.numpy as jnp
from jax.experimental import pallas as pl
from jax.experimental.pallas import tpu as pltpu

EPS = 1e-6


def _round_up(x, m):
    return (x + m - 1) // m * m


def gem_kernel(p_ref, x_ref, o_ref, acc_ref, *, hw, t_hw, need_mask):
    # p_ref   : (1,) f32 in SMEM (learnable GeM exponent)
    # x_ref   : (C, T_HW) spatial tile of one batch element (VMEM)
    # o_ref   : (C, 1) output block, written only on the last spatial tile
    # acc_ref : (C, 1) f32 accumulator scratch (persists across grid steps)
    t = pl.program_id(1)

    @pl.when(t == 0)
    def _init():
        acc_ref[...] = jnp.zeros_like(acc_ref)

    x = x_ref[...].astype(jnp.float32)                       # (C, T_HW)

    # --- L2N over the channel axis, per spatial position -------------------
    # Hoist the reciprocal to the (1, T_HW) row: one EUP reciprocal per column
    # instead of a divide per (C, T_HW) element; the broadcast multiply is
    # cheap VPU work.  Exact (non-approx) to hold the reference tolerance.
    norm = jnp.sqrt(jnp.sum(x * x, axis=0, keepdims=True))   # (1, T_HW)
    inv = 1.0 / (norm + EPS)                                 # (1, T_HW)
    y = x * inv                                              # (C, T_HW)

    # --- GeM: clamp(min=eps) ** p, partial sum over this spatial tile ------
    p = p_ref[0]
    z = jnp.power(jnp.maximum(y, EPS), p)                    # (C, T_HW)

    if need_mask:
        # Zero out padded spatial columns so the mean is exact.
        col = jax.lax.broadcasted_iota(jnp.int32, (1, t_hw), 1) + t * t_hw
        z = jnp.where(col < hw, z, 0.0)

    acc_ref[...] += jnp.sum(z, axis=1, keepdims=True)        # (C, 1)

    # --- finalize on the last spatial tile ----------------------------------
    @pl.when(t == pl.num_programs(1) - 1)
    def _finalize():
        m = acc_ref[...] * (1.0 / hw)                        # true spatial mean
        o_ref[...] = jnp.power(m, 1.0 / p).astype(o_ref.dtype)


def gem_forward(x_nchw, p, *, max_block_bytes=4 * 1024 * 1024):
    """x_nchw: (N, C, H, W); p: (1,) float. Returns (N, C, 1, 1)."""
    N, C, H, W = x_nchw.shape
    HW = H * W
    x2 = x_nchw.reshape(N, C, HW)

    # Lane tile: multiple of 128, sized so one (C, T_HW) input block is at most
    # ~max_block_bytes (the pipeline double-buffers it -> ~2x that in VMEM).
    itemsize = jnp.dtype(x_nchw.dtype).itemsize
    max_lanes = max(128, (max_block_bytes // max(1, C * itemsize)) // 128 * 128)
    t_hw = min(_round_up(HW, 128), max_lanes)
    hw_padded = _round_up(HW, t_hw)
    num_tiles = hw_padded // t_hw

    if hw_padded != HW:
        x2 = jnp.pad(x2, ((0, 0), (0, 0), (0, hw_padded - HW)))

    kernel = functools.partial(
        gem_kernel, hw=HW, t_hw=t_hw, need_mask=(hw_padded != HW)
    )

    # NOTE: for batch-1 inference on v7x (2 TensorCores) the spatial tiles could
    # additionally be split across cores with a tiny epilogue combine; kept
    # sequential here because the accumulator lives on one core's scratch.
    out = pl.pallas_call(
        kernel,
        out_shape=jax.ShapeDtypeStruct((N, C, 1), x_nchw.dtype),
        grid=(N, num_tiles),
        in_specs=[
            pl.BlockSpec(memory_space=pltpu.SMEM),                  # p (scalar)
            pl.BlockSpec((None, C, t_hw), lambda n, t: (n, 0, t)),  # (C, T_HW)
        ],
        out_specs=pl.BlockSpec((None, C, 1), lambda n, t: (n, 0, 0)),
        scratch_shapes=[pltpu.VMEM((C, 1), jnp.float32)],
        compiler_params=pltpu.CompilerParams(
            dimension_semantics=("parallel", "arbitrary"),
            vmem_limit_bytes=32 * 1024 * 1024,
        ),
    )(p.astype(jnp.float32), x2)
    return out.reshape(N, C, 1, 1)


def gem_reference(x, p):
    """Plain-JAX reference mirroring the PyTorch module."""
    norm = jnp.sqrt(jnp.sum(x * x, axis=1, keepdims=True))
    y = x / (norm + EPS)
    z = jnp.power(jnp.maximum(y, EPS), p[0])
    m = jnp.mean(z, axis=(2, 3), keepdims=True)
    return jnp.power(m, 1.0 / p[0])


if __name__ == "__main__":
    key = jax.random.PRNGKey(0)
    p = jnp.ones((1,), dtype=jnp.float32) * 3.0   # GEM.__init__: p = ones(1) * 3

    # Main small test (module-sized shapes).
    N, C, H, W = 2, 4, 16, 16
    x = jax.random.normal(key, (N, C, H, W), dtype=jnp.float32)
    out = jax.block_until_ready(gem_forward(x, p))
    ref = gem_reference(x, p)
    assert out.shape == (N, C, 1, 1)
    assert jnp.allclose(out, ref, rtol=1e-4, atol=1e-5), "mismatch vs reference"

    # Multi-tile accumulation path: force 128-lane tiles -> 2 spatial tiles.
    out2 = jax.block_until_ready(gem_forward(x, p, max_block_bytes=C * 128 * 4))
    assert jnp.allclose(out2, ref, rtol=1e-4, atol=1e-5), "multi-tile mismatch"

    # Padded / masked path: HW not a multiple of 128.
    x3 = jax.random.normal(jax.random.PRNGKey(1), (1, 3, 5, 5), dtype=jnp.float32)
    out3 = jax.block_until_ready(gem_forward(x3, p))
    ref3 = gem_reference(x3, p)
    assert jnp.allclose(out3, ref3, rtol=1e-4, atol=1e-5), "padded-path mismatch"

    print("KERNEL_OK")
</pallas_src>

<mosaic_0001>
module attributes {stable_mosaic.version = 11 : i64} {
  func.func @gem_kernel(%arg0: i32, %arg1: i32, %arg2: memref<1xf32, #tpu.memory_space<smem>>, %arg3: memref<1x4x256xf32, #tpu.memory_space<vmem>>, %arg4: memref<1x4x1xf32, #tpu.memory_space<vmem>>, %arg5: memref<4x1xf32, #tpu.memory_space<vmem>>) attributes {dimension_semantics = [#tpu.dimension_semantics<parallel>, #tpu.dimension_semantics<arbitrary>], iteration_bounds = array<i64: 2, 1>, scalar_prefetch = 0 : i64, scratch_operands = 1 : i64, tpu.core_type = #tpu.core_type<tc>, window_params = [{transform_indices = @transform_0, window_bounds = array<i64: 1>}, {transform_indices = @transform_1, window_bounds = array<i64: 1, 4, 256>}, {transform_indices = @transform_2, window_bounds = array<i64: 1, 4, 1>}]} {
    %c0_i32 = arith.constant 0 : i32
    %0 = arith.cmpi eq, %arg1, %c0_i32 : i32
    %1 = arith.extui %0 : i1 to i32
    %c0_i32_0 = arith.constant 0 : i32
    %2 = arith.cmpi ne, %1, %c0_i32_0 : i32
    scf.if %2 {
      %cst_14 = arith.constant 0.000000e+00 : f32
      %28 = vector.broadcast %cst_14 : f32 to vector<4x1xf32>
      %c0_15 = arith.constant 0 : index
      %c0_16 = arith.constant 0 : index
      %29 = vector.load %arg5[%c0_15, %c0_16] : memref<4x1xf32, #tpu.memory_space<vmem>>, vector<4x1xf32>
      tpu.vector_store %arg5[%c0_15, %c0_16], %28 {strides = array<i32>} : memref<4x1xf32, #tpu.memory_space<vmem>>, vector<4x1xf32>,
    } else {
    }
    %c0 = arith.constant 0 : index
    %c0_1 = arith.constant 0 : index
    %c0_2 = arith.constant 0 : index
    %3 = vector.load %arg3[%c0, %c0_1, %c0_2] : memref<1x4x256xf32, #tpu.memory_space<vmem>>, vector<1x4x256xf32>
    %4 = vector.shape_cast %3 : vector<1x4x256xf32> to vector<4x256xf32>
    %5 = arith.mulf %4, %4 : vector<4x256xf32>
    %cst = arith.constant dense<0.000000e+00> : vector<256xf32>
    %6 = vector.multi_reduction <add>, %5, %cst [0] : vector<4x256xf32> to vector<256xf32>
    %7 = vector.shape_cast %6 : vector<256xf32> to vector<1x256xf32>
    %8 = math.sqrt %7 : vector<1x256xf32>
    %cst_3 = arith.constant 9.99999997E-7 : f32
    %9 = vector.broadcast %cst_3 : f32 to vector<1x256xf32>
    %10 = arith.addf %8, %9 : vector<1x256xf32>
    %cst_4 = arith.constant 1.000000e+00 : f32
    %11 = vector.broadcast %cst_4 : f32 to vector<1x256xf32>
    %12 = arith.divf %11, %10 : vector<1x256xf32>
    %13 = vector.broadcast %12 : vector<1x256xf32> to vector<4x256xf32>
    %14 = arith.mulf %4, %13 : vector<4x256xf32>
    %c0_5 = arith.constant 0 : index
    %15 = memref.load %arg2[%c0_5] : memref<1xf32, #tpu.memory_space<smem>>
    %cst_6 = arith.constant 9.99999997E-7 : f32
    %16 = vector.broadcast %cst_6 : f32 to vector<4x256xf32>
    %17 = arith.maximumf %14, %16 : vector<4x256xf32>
    %18 = vector.broadcast %15 : f32 to vector<4x256xf32>
    %19 = math.powf %17, %18 : vector<4x256xf32>
    %c0_7 = arith.constant 0 : index
    %c0_8 = arith.constant 0 : index
    %20 = vector.load %arg5[%c0_7, %c0_8] : memref<4x1xf32, #tpu.memory_space<vmem>>, vector<4x1xf32>
    %cst_9 = arith.constant dense<0.000000e+00> : vector<4xf32>
    %21 = vector.multi_reduction <add>, %19, %cst_9 [1] : vector<4x256xf32> to vector<4xf32>
    %22 = vector.shape_cast %21 : vector<4xf32> to vector<4x1xf32>
    %23 = arith.addf %20, %22 : vector<4x1xf32>
    %c0_10 = arith.constant 0 : index
    %c0_11 = arith.constant 0 : index
    %24 = vector.load %arg5[%c0_10, %c0_11] : memref<4x1xf32, #tpu.memory_space<vmem>>, vector<4x1xf32>
    tpu.vector_store %arg5[%c0_10, %c0_11], %23 {strides = array<i32>} : memref<4x1xf32, #tpu.memory_space<vmem>>, vector<4x1xf32>,
    %c0_i32_12 = arith.constant 0 : i32
    %25 = arith.cmpi eq, %arg1, %c0_i32_12 : i32
    %26 = arith.extui %25 : i1 to i32
    %c0_i32_13 = arith.constant 0 : i32
    %27 = arith.cmpi ne, %26, %c0_i32_13 : i32
    scf.if %27 {
      %c0_14 = arith.constant 0 : index
      %c0_15 = arith.constant 0 : index
      %28 = vector.load %arg5[%c0_14, %c0_15] : memref<4x1xf32, #tpu.memory_space<vmem>>, vector<4x1xf32>
      %cst_16 = arith.constant 3.906250e-03 : f32
      %29 = vector.broadcast %cst_16 : f32 to vector<4x1xf32>
      %30 = arith.mulf %28, %29 : vector<4x1xf32>
      %cst_17 = arith.constant 1.000000e+00 : f32
      %31 = arith.divf %cst_17, %15 : f32
      %32 = vector.broadcast %31 : f32 to vector<4x1xf32>
      %33 = math.powf %30, %32 : vector<4x1xf32>
      %c0_18 = arith.constant 0 : index
      %c0_19 = arith.constant 0 : index
      %c0_20 = arith.constant 0 : index
      %34 = vector.load %arg4[%c0_18, %c0_19, %c0_20] : memref<1x4x1xf32, #tpu.memory_space<vmem>>, vector<1x4x1xf32>
      %35 = vector.shape_cast %34 : vector<1x4x1xf32> to vector<4x1xf32>
      %36 = vector.shape_cast %33 : vector<4x1xf32> to vector<1x4x1xf32>
      tpu.vector_store %arg4[%c0_18, %c0_19, %c0_20], %36 {strides = array<i32>} : memref<1x4x1xf32, #tpu.memory_space<vmem>>, vector<1x4x1xf32>,
    } else {
    }
    return
  }
  func.func @transform_0(%arg0: i32, %arg1: i32) -> i32 {
    %c0_i32 = arith.constant 0 : i32
    %c0_i32_0 = arith.constant 0 : i32
    return %c0_i32 : i32
  }
  func.func @transform_1(%arg0: i32, %arg1: i32) -> (i32, i32, i32) {
    %c0_i32 = arith.constant 0 : i32
    %c0_i32_0 = arith.constant 0 : i32
    return %arg0, %c0_i32, %arg1 : i32, i32, i32
  }
  func.func @transform_2(%arg0: i32, %arg1: i32) -> (i32, i32, i32) {
    %c0_i32 = arith.constant 0 : i32
    %c0_i32_0 = arith.constant 0 : i32
    %c0_i32_1 = arith.constant 0 : i32
    return %arg0, %c0_i32, %c0_i32_0 : i32, i32, i32
  }
}

</mosaic_0001>

<bundles_post_ra>
// kernel: tpu_custom_call.1
= control target key start
LH: loop header
LB: loop body
LE: loop exit
PB: predicated region body
PF: predicated region fallthrough
CT: control target
= control target key end

     0   :  { %s833_s0 = inlined_call_operand.<no memory space> [shape: f32[1], index: 0, kind: input, shape index: {}]   ;;  %s834_s1 = inlined_call_operand.hbm [shape: f32[2,4,256], index: 1, kind: input, shape index: {}]   ;;  %s835_s2 = inlined_call_operand.vmem [shape: f32[2,4,1], index: 2, kind: output, shape index: {}]  }
   0x1   :  { %7 = sst [smem:[#allocation3]] %s833_s0 }
   0x2   :  { %8 = vsyncpa [#allocation5], 0 }
   0x3   :  { %10 = vsyncpa [#allocation5 + $0x1], 0  ;;  %s631_s11 = smov 0   ;;  %s633_s12 = smov 0  }
   0x4   :  { %s635_s13 = smov 0   ;;  %s637_s14 = smov 0  }
   0x5   :  { %s639_s15 = smov 0   ;;  %s641_s16 = smov 0  }
   0x6 LB: > { %s332_s0 = sadd.s32 4294967295, %s607_s16   ;;  %s28_s17 = sadd.s32 1, %s603_s15  ;;  %s607_s16 = sphi %s641_s16, %s16_s16   ;;  %s603_s15 = sphi %s639_s15, %s856_s15   ;;  %s599_s14 = sphi %s637_s14, %s855_s14   ;;  %s595_s13 = sphi %s635_s13, %s854_s13   ;;  %s591_s12 = sphi %s633_s12, %s853_s12   ;;  %s587_s11 = sphi %s631_s11, %s852_s11  }
   0x7   : > { %p30_p0 = scmp.ge.s32.totalorder %s28_s17, 2  ;;  %s58_s18 = sadd.s32 1, %s595_s13 }
   0x8   : > { %p65_p1 = scmp.ne.s32.totalorder %s595_s13, %s591_s12  ;;  %p66_p2 = scmp.eq.s32.totalorder %s607_s16, 0 }
   0x9   : > { %s858_s17 = smov (%p30_p0, %s28_s17), 0  ;;  %p71_p4 = scmp.ne.s32.totalorder %s591_s12, %s587_s11 }
   0xa   : > { %p667_p3 = por %p66_p2, %p65_p1  ;;  %s53_s20 = ssub.s32 %s603_s15, %s858_s17 }
   0xb   : > { %p72_p5 = scmp.eq.s32.totalorder %s332_s0, 0  ;;  %p56_p6 = scmp.eq.s32.totalorder %s53_s20, 0 }
   0xc   : > { %p457_p8 = scmp.lt.s32.totalorder %s607_s16, 2  ;;  %s124_s23 = sand.u32 1, %s595_s13  }
   0xd   : > { %p674_p7 = por %p72_p5, %p71_p4  ;;  %s344_s24 = sshll.u32 %s603_s15, 7 }
   0xe   : > { %s680_s22 = scalar_select %p56_p6, %s595_s13, %s58_s18  }
   0xf   : > { %s336_s25 = sshll.u32 %s124_s23, 3  ;;  %s687_s28 = scalar_lea.hbm %s834_s1, %s344_s24 }
  0x10   : > { %s128_s29 = scalar_lea.vmem [#allocation4], %s336_s25  ;;  %p691_p9 = pnand %p457_p8, %p667_p3 }
  0x11   : > { %s138_s30 = sshll.u32 %s128_s29, 4  ;;  %s125_s4 = scalar_lea.sflag [#allocation5], %s124_s23  ;;  %s695_s30 = int_to_ptr.vmem [resolvable:$true] %s138_s30 }
  0x12   : > { %s527_s5 = scalar_lea.hbm %s687_s28, 128  ;;  %p529_p13 = pneg %p691_p9 }
  0x13   : > { %p528_p12 = scmp.ne.s32.totalorder %s687_s28, %s527_s5  ;;  %s532_s8 = scalar_lea.hbm %s834_s1, 256 }
  0x14   : > { %p533_p2 = scmp.lt.u32.totalorder %s687_s28, %s834_s1  ;;  %p534_p3 = scmp.lt.u32.totalorder %s532_s8, %s527_s5 }
  0x15   : > { %p530_p0 = pnand %p529_p13, %p528_p12  ;;  %p536_p5 = scmp.lt.u32.totalorder %s527_s5, %s687_s28 }
  0x16   : > { %p535_p4 = por %p534_p3, %p533_p2 }
  0x17   : > { %p531_p1 = pneg %p530_p0 }
  0x18   : > { %p537_p6 = por %p536_p5, %p535_p4 }
  0x1a   : > { %p538_p8 = pnand %p537_p6, %p531_p1 }
  0x1c   : > { %541 = shalt.err (!%p538_p8)
}
  0x1d   : > { %s542_s11 = scalar_lea.vmem %s695_s30, 128  ;;  %s609_s0 = smov [#allocation4]  }
  0x1e   : > { %p543_p12 = scmp.ne.s32.totalorder %s695_s30, %s542_s11  ;;  %s547_s18 = sshll.u32 %s609_s0, 4  ;;  %s548_s18 = int_to_ptr.vmem [resolvable:$false] %s547_s18 }
  0x1f   : > { %s549_s19 = scalar_lea.vmem %s548_s18, 256  ;;  %p550_p11 = scmp.lt.s32.totalorder %s695_s30, %s548_s18 }
  0x20   : > { %p545_p0 = pnand %p543_p12, %p529_p13  ;;  %p551_p2 = scmp.lt.s32.totalorder %s549_s19, %s542_s11 }
  0x22   : > { %p546_p10 = pneg %p545_p0  ;;  %p552_p3 = por %p551_p2, %p550_p11 }
  0x24   : > { %p553_p4 = pnand %p552_p3, %p546_p10 }
  0x26   : > { %556 = shalt.err (!%p553_p4)
}
  0x27   : > { %456 = dma.hbm_to_vmem [thread:$0]  (!%p691_p9), %s687_s28, 128, %s695_s30, %s125_s4  }
  0x28   : > { %p840_p1 = scmp.lt.s32.totalorder %s607_s16, 3  ;;  %p841_p5 = scmp.ge.s32.totalorder %s607_s16, 1 }
  0x2a   : > { %p144_p13 = pnand %p841_p5, %p840_p1 }
  0x2b   : > { %s149_s20 = sand.u32 (!%p144_p13), 1, %s591_s12  }
  0x2c   : > { %147 = sbr.rel (%p144_p13) target bundleno = 336 (0x150), region = 28  ;;  %s340_s23 = sshll.u32 (!%p144_p13), %s149_s20, 3 }
  0x2d   : > { %s150_s24 = scalar_lea.sflag (!%p144_p13), [#allocation5], %s149_s20  ;;  %s153_s25 = scalar_lea.vmem (!%p144_p13), [#allocation4], %s340_s23 }
  0x33   : > { %582 = dma.done.wait (%p674_p7), %s150_s24, 128  }
  0x34   : > { %584 = vsyncadd (%p674_p7), %s150_s24, 4294967168  ;;  %vm836_vm0 = vcmask 3072   ;;  %v610_v0 = vmov 0.0   ;;  %s229_s26 = sld [smem:[#allocation3]]  ;;  %v184_v1 = vld [vmem:[%s153_s25] sm:$0xff]  ;;  %vm189_vm1 = vcmask 1043456  }
  0x35   : > { %183 = vst.msk [vmem:[#allocation2] sm:$0xf] %vm836_vm0, %v610_v0  ;;  %v185_v3 = vmul.f32 %v184_v1, %v184_v1  ;;  %v611_v46 = vmov 2139095040   ;;  %v612_v49 = vmov 0   ;;  %p174_p7 = scmp.lt.s32.totalorder %s599_s14, 1 }
  0x37   : > { %v187_v4 = vcombine.high %v185_v3, %v185_v3  ;;  %v190_v5 = vsel %vm189_vm1, %v185_v3, 0.0  ;;  %s860_s14 = smov (!%p174_p7, %s599_s14), 1 }
  0x38   : > { %v191_v6 = vrot.slane %v190_v5, 4  ;;  %s341_s27 = sshll.u32 %s860_s14, 2 }
  0x39   : > { %v197_v7 = vsel %vm189_vm1, %v187_v4, 0.0  ;;  %s177_s30 = scalar_lea.vmem %s835_s2, %s341_s27 }
  0x3a   : > { %v734_v2 = vstv %s229_s26  ;;  %v192_v8 = vadd.f32 %v191_v6, %v190_v5  ;;  %v198_v9 = vrot.slane %v197_v7, 4 }
  0x3b   : > { %509 = vrcp.f32 %v734_v2  ;;  %v349_v37 = vand.u32 2147483647, %v734_v2  ;;  %v354_v40 = vtrunc.f32 %v734_v2  ;;  %vm353_vm11 = vcmp.lt.f32.partialorder %v734_v2, 0 }
  0x3c   : > { %v193_v10 = vrot.slane %v192_v8, 2  ;;  %v199_v11 = vadd.f32 %v198_v9, %v197_v7  ;;  %v385_v47 = vsel %vm353_vm11, 0, %v611_v46  ;;  %v373_v50 = vsel %vm353_vm11, 2139095040, %v612_v49  ;;  %v233_v6 = vld [vmem:[#allocation2] sm:$0xf] }
  0x3d   : > { %v358_v39 = vtrunc.f32 %v349_v37  ;;  %vm350_vm6 = vcmp.eq.f32.partialorder %v349_v37, 2139095040  ;;  %vm355_vm7 = vcmp.ne.f32.partialorder %v734_v2, %v354_v40  ;;  %vm357_vm15 = vcmp.lt.f32.partialorder %v349_v37, 1266679808 }
  0x3e   : > { %v194_v12 = vadd.f32 %v193_v10, %v192_v8  ;;  %v200_v13 = vrot.slane %v199_v11, 2  ;;  %vm743_vm8 = vmor %vm355_vm7, %vm350_vm6  ;;  %v386_v48 = vxor.u32 2147483648, %v385_v47 }
  0x3f   : > { %v359_v41 = vcvt.f32.s32 %v358_v39  ;;  %vm362_vm10 = vmneg %vm743_vm8 }
  0x40   : > { %v195_v15 = vrot.slane %v194_v12, 1  ;;  %v201_v16 = vadd.f32 %v200_v13, %v199_v11 }
  0x41   : > { %v360_v42 = vand.u32 1, %v359_v41 }
  0x42   : > { %v196_v17 = vadd.f32 %v195_v15, %v194_v12  ;;  %v202_v18 = vrot.slane %v201_v16, 1 }
  0x43   : > { %vm361_vm9 = vcmp.eq.s32.totalorder %v360_v42, 1 }
  0x44   : > { %v203_v19 = vadd.f32 %v202_v18, %v201_v16  ;;  %511 = vrsqrt.f32 %v196_v17  ;;  %vm206_vm2 = vcmp.eq.f32.partialorder %v196_v17, inf  ;;  %v209_v21 = vand.u32 2147483648, %v196_v17  ;;  %vm363_vm14 = vmand %vm361_vm9, %vm362_vm10 }
  0x45   : > { %v510_v14 = vpop.eup %509  ;;  %vm208_vm3 = vcmp.eq.f32.partialorder %v196_v17, 0.0 }
  0x46   : > { %397 = vpush %v510_v14  ;;  %513 = vrsqrt.f32 %v203_v19  ;;  %vm213_vm4 = vcmp.eq.f32.partialorder %v203_v19, inf  ;;  %v216_v24 = vand.u32 2147483648, %v203_v19  ;;  %vm215_vm5 = vcmp.eq.f32.partialorder %v203_v19, 0.0 }
  0x4e   : > { %v512_v20 = vpop.eup %511 }
  0x4f   : > { %v205_v22 = vmul.f32 %v512_v20, %v196_v17 }
  0x50   : > { %v514_v23 = vpop.eup %513 }
  0x51   : > { %v207_v25 = vsel %vm206_vm2, %v196_v17, %v205_v22  ;;  %v212_v26 = vmul.f32 %v514_v23, %v203_v19 }
  0x52   : > { %v210_v27 = vsel %vm208_vm3, %v209_v21, %v207_v25 }
  0x53   : > { %v214_v28 = vsel %vm213_vm4, %v203_v19, %v212_v26  ;;  %v218_v29 = vadd.f32 1e-06, %v210_v27 }
  0x54   : > { %v217_v30 = vsel %vm215_vm5, %v216_v24, %v214_v28  ;;  %vm364_vm5 = vmand %vm357_vm15, %vm363_vm14 }
  0x55   : > { %v219_v31 = vadd.f32 1e-06, %v217_v30  ;;  %515 = vrcp.f32 %v218_v29  ;;  %v387_v54 = vsel %vm364_vm5, %v386_v48, %v385_v47 }
  0x57   : > { %517 = vrcp.f32 %v219_v31 }
  0x5f   : > { %v516_v32 = vpop.eup %515 }
  0x61   : > { %v518_v33 = vpop.eup %517 }
  0x62   : > { %v226_v34 = vcombine.low %v516_v32, %v518_v33 }
  0x64   : > { %v228_v35 = vmul.f32 %v226_v34, %v184_v1 }
  0x66   : > { %v230_v36 = vmax.f32 %v228_v35, 1e-06 }
  0x68   : > { %v345_v38 = vand.u32 2147483647, %v230_v36  ;;  %vm366_vm12 = vcmp.eq.f32.partialorder %v230_v36, 0  ;;  %vm365_vm4 = vcmp.lt.f32.partialorder %v230_v36, 0  ;;  %vm368_vm10 = vcmp.lt.s32.totalorder %v230_v36, 0 }
  0x69   : > { %vm378_vm2 = vmand %vm353_vm11, %vm366_vm12  ;;  %vm390_vm15 = vcmp.ne.f32.partialorder %v230_v36, %v230_v36  ;;  %v388_v58 = vsel %vm365_vm4, %v387_v54, %v385_v47 }
  0x6a   : > { %519 = vlog2.f32 %v345_v38  ;;  %vm369_vm13 = vcmp.gt.f32.partialorder %v345_v38, 1065353216  ;;  %vm371_vm9 = vmand %vm365_vm4, %vm743_vm8  ;;  %vm351_vm8 = vcmp.eq.f32.partialorder %v734_v2, 0  ;;  %vm370_vm0 = vcmp.eq.f32.partialorder %v345_v38, 2139095040 }
  0x6b   : > { %vm379_vm3 = vmxor %vm353_vm11, %vm369_vm13  ;;  %vm382_vm13 = vcmp.eq.f32.partialorder %v230_v36, 3212836864  ;;  %vm844_vm4 = vcmask 3072  }
  0x6c   : > { %vm380_vm7 = vmor %vm378_vm2, %vm379_vm3  ;;  %vm391_vm2 = vcmp.ne.f32.partialorder %v734_v2, %v734_v2  ;;  %vm367_vm3 = vcmp.eq.f32.partialorder %v230_v36, 1065353216 }
  0x6d   : > { %v381_v52 = vsel %vm380_vm7, 2139095040, %v612_v49  ;;  %vm375_vm14 = vmand %vm368_vm10, %vm364_vm5 }
  0x6e   : > { %v383_v57 = vsel %vm382_vm13, 1065353216, %v381_v52  ;;  %vm392_vm11 = vmor %vm390_vm15, %vm391_vm2 }
  0x6f   : > { %vm394_vm7 = vmor %vm367_vm3, %vm351_vm8 }
  0x74   : > { %v520_v44 = vpop.eup %519 }
  0x75   : > { %v347_v45 = vmul.f32 %v520_v44, %v734_v2 }
  0x77   : > { %521 = vpow2.f32 %v347_v45  ;;  %s398_s21 = spop %397 }
  0x78   : > { %v253_v10 = vstv %s398_s21 }
  0x79   : > { %v403_v12 = vand.u32 2147483647, %v253_v10  ;;  %v408_v14 = vtrunc.f32 %v253_v10  ;;  %vm407_vm10 = vcmp.lt.f32.partialorder %v253_v10, 0 }
  0x7a   : > { %v439_v21 = vsel %vm407_vm10, 0, %v611_v46  ;;  %v427_v26 = vsel %vm407_vm10, 2139095040, %v612_v49 }
  0x7b   : > { %v412_v13 = vtrunc.f32 %v403_v12  ;;  %v440_v23 = vxor.u32 2147483648, %v439_v21 }
  0x7d   : > { %v413_v15 = vcvt.f32.s32 %v412_v13 }
  0x7f   : > { %v414_v17 = vand.u32 1, %v413_v15 }
  0x81   : > { %v522_v51 = vpop.eup %521  ;;  %vm415_vm5 = vcmp.eq.s32.totalorder %v414_v17, 1 }
  0x82   : > { %v372_v53 = vsel %vm371_vm9, 2143289344, %v522_v51 }
  0x83   : > { %v374_v55 = vsel %vm366_vm12, %v373_v50, %v372_v53  ;;  %vm352_vm12 = vcmp.eq.f32.partialorder %v734_v2, 1065353216 }
  0x84   : > { %v376_v56 = vxor.u32 2147483648, %v374_v55 }
  0x86   : > { %v377_v59 = vsel %vm375_vm14, %v376_v56, %v374_v55  ;;  %vm411_vm14 = vcmp.lt.f32.partialorder %v403_v12, 1266679808 }
  0x87   : > { %v384_v60 = vsel %vm350_vm6, %v383_v57, %v377_v59 }
  0x88   : > { %v389_v61 = vsel %vm370_vm0, %v388_v58, %v384_v60  ;;  %vm404_vm0 = vcmp.eq.f32.partialorder %v403_v12, 2139095040 }
  0x89   : > { %v393_v62 = vsel %vm392_vm11, 2143289344, %v389_v61 }
  0x8a   : > { %v395_v63 = vsel %vm394_vm7, 1065353216, %v393_v62 }
  0x8b   : > { %v396_v0 = vsel %vm352_vm12, %v230_v36, %v395_v63 }
  0x8c   : > { %v235_v1 = vcombine.high %v396_v0, %v396_v0  ;;  %v237_v3 = vsel %vm189_vm1, %v396_v0, 0.0 }
  0x8e   : > { %v238_v4 = vsel %vm189_vm1, %v235_v1, 0.0  ;;  %vm409_vm1 = vcmp.ne.f32.partialorder %v253_v10, %v408_v14 }
  0x8f   : > { %v239_v5 = vadd.f32 %v238_v4, %v237_v3  ;;  %vm777_vm6 = vmor %vm409_vm1, %vm404_vm0 }
  0x90   : > { %vm416_vm9 = vmneg %vm777_vm6 }
  0x91   : > { %240 = vadd.xlane.f32.xlu0 %v239_v5  ;;  %vm417_vm15 = vmand %vm415_vm5, %vm416_vm9 }
  0x92   : > { %vm791_vm3 = vmand %vm411_vm14, %vm417_vm15  ;;  %vm445_vm14 = vcmp.ne.f32.partialorder %v253_v10, %v253_v10 }
  0x93   : > { %v441_v30 = vsel %vm791_vm3, %v440_v23, %v439_v21 }
 0x11e   : > { %v241_v7 = vpop.xlane.xlu0 %240 }
 0x11f   : > { %v242_v8 = vadd.f32 %v241_v7, %v233_v6 }
 0x121   : > { %244 = vst.msk [vmem:[#allocation2] sm:$0xf] %vm844_vm4, %v242_v8 }
 0x128   : > { %v248_v9 = vld [vmem:[#allocation2] sm:$0xf] }
 0x129   : > { %v249_v2 = vmul.f32 0.00390625, %v248_v9 }
 0x12b   : > { %v399_v11 = vand.u32 2147483647, %v249_v2  ;;  %vm420_vm2 = vcmp.eq.f32.partialorder %v249_v2, 0  ;;  %vm419_vm11 = vcmp.lt.f32.partialorder %v249_v2, 0  ;;  %vm422_vm1 = vcmp.lt.s32.totalorder %v249_v2, 0 }
 0x12c   : > { %vm432_vm7 = vmand %vm407_vm10, %vm420_vm2  ;;  %vm436_vm9 = vcmp.eq.f32.partialorder %v249_v2, 3212836864  ;;  %vm421_vm15 = vcmp.eq.f32.partialorder %v249_v2, 1065353216  ;;  %v442_v34 = vsel %vm419_vm11, %v441_v30, %v439_v21 }
 0x12d   : > { %523 = vlog2.f32 %v399_v11  ;;  %vm423_vm13 = vcmp.gt.f32.partialorder %v399_v11, 1065353216  ;;  %vm425_vm4 = vmand %vm419_vm11, %vm777_vm6  ;;  %vm405_vm6 = vcmp.eq.f32.partialorder %v253_v10, 0 }
 0x12e   : > { %vm784_vm8 = vmxor %vm407_vm10, %vm423_vm13  ;;  %vm444_vm13 = vcmp.ne.f32.partialorder %v249_v2, %v249_v2 }
 0x12f   : > { %vm434_vm12 = vmor %vm432_vm7, %vm784_vm8  ;;  %vm424_vm8 = vcmp.eq.f32.partialorder %v399_v11, 2139095040  ;;  %vm851_vm7 = vcmask 3072  }
 0x130   : > { %v435_v28 = vsel %vm434_vm12, 2139095040, %v612_v49  ;;  %vm429_vm5 = vmand %vm422_vm1, %vm791_vm3  ;;  %vm406_vm3 = vcmp.eq.f32.partialorder %v253_v10, 1065353216 }
 0x131   : > { %v437_v32 = vsel %vm436_vm9, 1065353216, %v435_v28  ;;  %vm446_vm10 = vmor %vm444_vm13, %vm445_vm14 }
 0x137   : > { %v524_v16 = vpop.eup %523 }
 0x138   : > { %v401_v18 = vmul.f32 %v524_v16, %v253_v10 }
 0x13a   : > { %525 = vpow2.f32 %v401_v18 }
 0x144   : > { %v526_v24 = vpop.eup %525 }
 0x145   : > { %v426_v25 = vsel %vm425_vm4, 2143289344, %v526_v24 }
 0x146   : > { %v428_v27 = vsel %vm420_vm2, %v427_v26, %v426_v25  ;;  %vm448_vm2 = vmor %vm421_vm15, %vm405_vm6 }
 0x147   : > { %v430_v29 = vxor.u32 2147483648, %v428_v27 }
 0x149   : > { %v431_v31 = vsel %vm429_vm5, %v430_v29, %v428_v27 }
 0x14a   : > { %v438_v33 = vsel %vm404_vm0, %v437_v32, %v431_v31 }
 0x14b   : > { %v443_v35 = vsel %vm424_vm8, %v442_v34, %v438_v33 }
 0x14c   : > { %v447_v36 = vsel %vm446_vm10, 2143289344, %v443_v35 }
 0x14d   : > { %v449_v37 = vsel %vm448_vm2, 1065353216, %v447_v36 }
 0x14e   : > { %v450_v38 = vsel %vm406_vm3, %v249_v2, %v449_v37 }
 0x14f   : > { %255 = vst.msk [vmem:[%s177_s30] sm:$0xf] %vm851_vm7, %v450_v38 }
 0x150 PF: > { %s16_s16 = sadd.s32 1, %s607_s16   ;;  %s852_s11 = smov %s591_s12 }
 0x151   : > { %p13_p9 = scmp.ge.s32.totalorder %s16_s16, 4   ;;  %s853_s12 = smov %s595_s13 }
 0x152   : > { %s854_s13 = smov %s680_s22  ;;  %s855_s14 = smov %s603_s15 }
 0x153   : > { %s856_s15 = smov %s858_s17  ;;  %15 = sbr.rel (!%p13_p9) target bundleno = 6 (0x6), region = 76 }
 0x15a   :  { %275 = vsyncpa [#allocation5], 1 }
 0x15b   :  { %277 = vsyncpa [#allocation5 + $0x1], 1 }

</bundles_post_ra>
